<compile_context>
chip_gen: v7x
topology: tpu7x:2x2x1
jax: 0.10.0
libtpu: 0.0.40
codegen_flags: <defaults>
</compile_context>

<pallas_src>
import jax
import jax.numpy as jnp
from jax.experimental import pallas as pl
from jax.experimental.pallas import tpu as pltpu

GROUP = 8  # batch rows packed per grouped row (lane-packing factor)


def mlp_kernel(xg_ref, w1_ref, b1_ref, w2_ref, b2_ref, og_ref):
    # xg_ref: (TG, GROUP*10) -- 8 batch rows per grouped row, features on lanes
    # w1_ref: (GROUP*10, GROUP*10) = kron(I_8, W1.T)   (VMEM-resident)
    # b1_ref: (1, GROUP*10) f32
    # w2_ref: (GROUP*10, GROUP*5) = kron(I_8, W2.T)    (VMEM-resident)
    # b2_ref: (1, GROUP*5)  f32
    xg = xg_ref[...]

    # net1 + ReLU, f32 accumulation on the MXU.
    h = jnp.dot(xg, w1_ref[...], preferred_element_type=jnp.float32)
    h = jnp.maximum(h + b1_ref[...], 0.0)

    # net2
    y = jnp.dot(h.astype(w2_ref.dtype), w2_ref[...],
                preferred_element_type=jnp.float32)
    og_ref[...] = (y + b2_ref[...]).astype(og_ref.dtype)


def simple_model_forward(x, w1, b1, w2, b2, *, tb=32768):
    """Forward of SimpleModel:  relu(x @ w1.T + b1) @ w2.T + b2.

    x:  [B, 10]   (f32 or bf16; bf16 halves HBM traffic on v6e/v7x)
    w1: [10, 10]  (out, in) -- nn.Linear.weight layout
    b1: [10]
    w2: [5, 10]   (out, in)
    b2: [5]
    returns [B, 5] in x.dtype
    """
    B, in_f = x.shape
    hid_f = w1.shape[0]
    out_f = w2.shape[0]

    # Grouping only needs B % GROUP == 0: pad at most GROUP-1 rows (rare, tiny).
    pad = (-B) % GROUP
    if pad:
        x = jnp.concatenate([x, jnp.zeros((pad, in_f), x.dtype)], axis=0)
    bp = B + pad
    bg = bp // GROUP

    gin, ghid, gout = GROUP * in_f, GROUP * hid_f, GROUP * out_f

    # Free (bitcast) reshape: row-major [bp, in_f] -> [bg, GROUP*in_f].
    xg = x.reshape(bg, gin)

    # Block-diagonal weights: (grouped_row @ kron(I, W.T)) == per-row (x @ W.T).
    # Tiny (80x80 / 80x40); fetched once and kept VMEM-resident in the kernel.
    w1_blk = jnp.kron(jnp.eye(GROUP, dtype=w1.dtype), w1.T)    # (gin, ghid)
    w2_blk = jnp.kron(jnp.eye(GROUP, dtype=w2.dtype), w2.T)    # (ghid, gout)
    b1_rep = jnp.tile(b1.astype(jnp.float32), GROUP)[None, :]  # (1, ghid)
    b2_rep = jnp.tile(b2.astype(jnp.float32), GROUP)[None, :]  # (1, gout)

    # Batch tile: tb batch rows -> tg grouped rows (multiple of 8 sublanes),
    # clamped so small batches use a single full-extent block.
    tg = max(8, (tb // GROUP) // 8 * 8)
    tg = min(tg, bg)
    grid = (pl.cdiv(bg, tg),)  # ragged last tile masked by Pallas, no jnp.pad

    itemsize = x.dtype.itemsize
    cost = pl.CostEstimate(
        flops=2 * B * (in_f * hid_f + hid_f * out_f),
        transcendentals=0,
        bytes_accessed=(B * in_f + B * out_f) * itemsize
        + (w1.size + w2.size) * w1.dtype.itemsize
        + (b1.size + b2.size) * 4,
    )

    out_g = pl.pallas_call(
        mlp_kernel,
        out_shape=jax.ShapeDtypeStruct((bg, gout), x.dtype),
        grid=grid,
        in_specs=[
            # Activations: tiled along the grouped-batch axis, double-buffered.
            pl.BlockSpec((tg, gin), lambda i: (i, 0)),
            # Tiny params: same block every step -> fetched once, VMEM-resident.
            pl.BlockSpec((gin, ghid), lambda i: (0, 0)),
            pl.BlockSpec((1, ghid), lambda i: (0, 0)),
            pl.BlockSpec((ghid, gout), lambda i: (0, 0)),
            pl.BlockSpec((1, gout), lambda i: (0, 0)),
        ],
        out_specs=pl.BlockSpec((tg, gout), lambda i: (i, 0)),
        compiler_params=pltpu.CompilerParams(
            # Independent batch tiles -> shard across both TCs (v7x megacore).
            dimension_semantics=("parallel",),
            # Headroom over the ~8.5 MiB footprint at tb=32768 (f32); within
            # physical VMEM on all of v5e / v6e / v7x.
            vmem_limit_bytes=32 * 1024 * 1024,
        ),
        cost_estimate=cost,
    )(xg, w1_blk, b1_rep, w2_blk, b2_rep)

    # Free (bitcast) reshape back to the PyTorch [B, out_f] layout.
    out = out_g.reshape(bp, out_f)
    return out[:B] if pad else out


def init_params(key):
    """nn.Linear-style U(-1/sqrt(fan_in), 1/sqrt(fan_in)) init, (out, in) layout."""
    k1, k2, k3, k4 = jax.random.split(key, 4)
    bound = 1.0 / jnp.sqrt(10.0)
    w1 = jax.random.uniform(k1, (10, 10), jnp.float32, -bound, bound)
    b1 = jax.random.uniform(k2, (10,), jnp.float32, -bound, bound)
    w2 = jax.random.uniform(k3, (5, 10), jnp.float32, -bound, bound)
    b2 = jax.random.uniform(k4, (5,), jnp.float32, -bound, bound)
    return w1, b1, w2, b2


if __name__ == "__main__":
    key = jax.random.PRNGKey(0)
    k_params, k_x1, k_x2 = jax.random.split(key, 3)
    w1, b1, w2, b2 = init_params(k_params)

    def ref_fwd(xr):
        return jnp.maximum(xr @ w1.T + b1, 0.0) @ w2.T + b2

    # 1) Clean multi-tile case: batch=2048, tb=1024 -> grid=(2,), pipelined.
    x1 = jax.random.normal(k_x1, (2048, 10), jnp.float32)
    out1 = jax.block_until_ready(simple_model_forward(x1, w1, b1, w2, b2, tb=1024))
    assert out1.shape == (2048, 5)
    assert jnp.allclose(out1, ref_fwd(x1), atol=1e-5, rtol=1e-5)

    # 2) Ragged case: batch=1003 (not a multiple of 8; last grid tile partial).
    x2 = jax.random.normal(k_x2, (1003, 10), jnp.float32)
    out2 = jax.block_until_ready(simple_model_forward(x2, w1, b1, w2, b2, tb=512))
    assert out2.shape == (1003, 5)
    assert jnp.allclose(out2, ref_fwd(x2), atol=1e-5, rtol=1e-5)

    # 3) bf16 activation/param storage (v6e/v7x bandwidth win), f32 MXU accum.
    xb = x1.astype(jnp.bfloat16)
    w1b, b1b, w2b, b2b = (p.astype(jnp.bfloat16) for p in (w1, b1, w2, b2))
    out3 = jax.block_until_ready(simple_model_forward(xb, w1b, b1b, w2b, b2b, tb=1024))
    assert out3.shape == (2048, 5) and out3.dtype == jnp.bfloat16
    assert jnp.allclose(out3.astype(jnp.float32), ref_fwd(x1), atol=5e-2, rtol=5e-2)

    print("KERNEL_OK")
</pallas_src>

<mosaic_0001>
module attributes {stable_mosaic.version = 11 : i64} {
  func.func @mlp_kernel(%arg0: i32, %arg1: memref<128x80xf32, #tpu.memory_space<vmem>>, %arg2: memref<80x80xf32, #tpu.memory_space<vmem>>, %arg3: memref<1x80xf32, #tpu.memory_space<vmem>>, %arg4: memref<80x40xf32, #tpu.memory_space<vmem>>, %arg5: memref<1x40xf32, #tpu.memory_space<vmem>>, %arg6: memref<128x40xf32, #tpu.memory_space<vmem>>) attributes {dimension_semantics = [#tpu.dimension_semantics<parallel>], iteration_bounds = array<i64: 2>, scalar_prefetch = 0 : i64, scratch_operands = 0 : i64, tpu.core_type = #tpu.core_type<tc>, window_params = [{transform_indices = @transform_0, window_bounds = array<i64: 128, 80>}, {pipeline_mode = #tpu.pipeline_mode<synchronous>, transform_indices = @transform_1, window_bounds = array<i64: 80, 80>}, {pipeline_mode = #tpu.pipeline_mode<synchronous>, transform_indices = @transform_2, window_bounds = array<i64: 1, 80>}, {pipeline_mode = #tpu.pipeline_mode<synchronous>, transform_indices = @transform_3, window_bounds = array<i64: 80, 40>}, {pipeline_mode = #tpu.pipeline_mode<synchronous>, transform_indices = @transform_4, window_bounds = array<i64: 1, 40>}, {transform_indices = @transform_5, window_bounds = array<i64: 128, 40>}]} {
    %c0 = arith.constant 0 : index
    %c0_0 = arith.constant 0 : index
    %0 = vector.load %arg1[%c0, %c0_0] : memref<128x80xf32, #tpu.memory_space<vmem>>, vector<128x80xf32>
    %c0_1 = arith.constant 0 : index
    %c0_2 = arith.constant 0 : index
    %1 = vector.load %arg2[%c0_1, %c0_2] : memref<80x80xf32, #tpu.memory_space<vmem>>, vector<80x80xf32>
    %cst = arith.constant dense<0.000000e+00> : vector<128x80xf32>
    %2 = tpu.matmul %0, %1, %cst {dimension_numbers = #tpu.dot_dimension_numbers<[1], [0], [0], [1], [0, 0, 1, 1], [], []>} : vector<128x80xf32>, vector<80x80xf32>, vector<128x80xf32> -> vector<128x80xf32>
    %c0_3 = arith.constant 0 : index
    %c0_4 = arith.constant 0 : index
    %3 = vector.load %arg3[%c0_3, %c0_4] : memref<1x80xf32, #tpu.memory_space<vmem>>, vector<1x80xf32>
    %4 = vector.broadcast %3 : vector<1x80xf32> to vector<128x80xf32>
    %5 = arith.addf %2, %4 : vector<128x80xf32>
    %cst_5 = arith.constant 0.000000e+00 : f32
    %6 = vector.broadcast %cst_5 : f32 to vector<128x80xf32>
    %7 = arith.maximumf %5, %6 : vector<128x80xf32>
    %c0_6 = arith.constant 0 : index
    %c0_7 = arith.constant 0 : index
    %8 = vector.load %arg4[%c0_6, %c0_7] : memref<80x40xf32, #tpu.memory_space<vmem>>, vector<80x40xf32>
    %cst_8 = arith.constant dense<0.000000e+00> : vector<128x40xf32>
    %9 = tpu.matmul %7, %8, %cst_8 {dimension_numbers = #tpu.dot_dimension_numbers<[1], [0], [0], [1], [0, 0, 1, 1], [], []>} : vector<128x80xf32>, vector<80x40xf32>, vector<128x40xf32> -> vector<128x40xf32>
    %c0_9 = arith.constant 0 : index
    %c0_10 = arith.constant 0 : index
    %10 = vector.load %arg5[%c0_9, %c0_10] : memref<1x40xf32, #tpu.memory_space<vmem>>, vector<1x40xf32>
    %11 = vector.broadcast %10 : vector<1x40xf32> to vector<128x40xf32>
    %12 = arith.addf %9, %11 : vector<128x40xf32>
    %c0_11 = arith.constant 0 : index
    %c0_12 = arith.constant 0 : index
    %13 = vector.load %arg6[%c0_11, %c0_12] : memref<128x40xf32, #tpu.memory_space<vmem>>, vector<128x40xf32>
    tpu.vector_store %arg6[%c0_11, %c0_12], %12 {strides = array<i32>} : memref<128x40xf32, #tpu.memory_space<vmem>>, vector<128x40xf32>,
    return
  }
  func.func @transform_0(%arg0: i32) -> (i32, i32) {
    %c0_i32 = arith.constant 0 : i32
    %c0_i32_0 = arith.constant 0 : i32
    return %arg0, %c0_i32 : i32, i32
  }
  func.func @transform_1(%arg0: i32) -> (i32, i32) {
    %c0_i32 = arith.constant 0 : i32
    %c0_i32_0 = arith.constant 0 : i32
    %c0_i32_1 = arith.constant 0 : i32
    return %c0_i32, %c0_i32_0 : i32, i32
  }
  func.func @transform_2(%arg0: i32) -> (i32, i32) {
    %c0_i32 = arith.constant 0 : i32
    %c0_i32_0 = arith.constant 0 : i32
    %c0_i32_1 = arith.constant 0 : i32
    return %c0_i32, %c0_i32_0 : i32, i32
  }
  func.func @transform_3(%arg0: i32) -> (i32, i32) {
    %c0_i32 = arith.constant 0 : i32
    %c0_i32_0 = arith.constant 0 : i32
    %c0_i32_1 = arith.constant 0 : i32
    return %c0_i32, %c0_i32_0 : i32, i32
  }
  func.func @transform_4(%arg0: i32) -> (i32, i32) {
    %c0_i32 = arith.constant 0 : i32
    %c0_i32_0 = arith.constant 0 : i32
    %c0_i32_1 = arith.constant 0 : i32
    return %c0_i32, %c0_i32_0 : i32, i32
  }
  func.func @transform_5(%arg0: i32) -> (i32, i32) {
    %c0_i32 = arith.constant 0 : i32
    %c0_i32_0 = arith.constant 0 : i32
    return %arg0, %c0_i32 : i32, i32
  }
}

</mosaic_0001>

<bundles_post_ra>
// kernel: tpu_custom_call.1
= control target key start
LH: loop header
LB: loop body
LE: loop exit
PB: predicated region body
PF: predicated region fallthrough
CT: control target
= control target key end

     0   :  { %s1025_s18 = smov 0   ;;  %s1199_s0 = inlined_call_operand.vmem [shape: f32[256,80], index: 0, kind: input, shape index: {}]   ;;  %s1200_s1 = inlined_call_operand.vmem [shape: f32[80,80], index: 1, kind: input, shape index: {}]   ;;  %s1201_s2 = inlined_call_operand.vmem [shape: f32[1,80], index: 2, kind: input, shape index: {}]   ;;  %s1202_s3 = inlined_call_operand.vmem [shape: f32[80,40], index: 3, kind: input, shape index: {}]   ;;  %s1203_s4 = inlined_call_operand.vmem [shape: f32[1,40], index: 4, kind: input, shape index: {}]   ;;  %s1204_s5 = inlined_call_operand.vmem [shape: f32[256,40], index: 5, kind: output, shape index: {}]  }
   0x1 LB: > { %s754_s19 = sadd.s32 4294967295, %s993_s18   ;;  %p758_p0 = scmp.ge.s32.totalorder %s993_s18, 1  ;;  %s993_s18 = sphi %s1025_s18, %s15_s18  }
   0x2   : > { %p188_p1 = scmp.lt.s32.totalorder %s993_s18, 3 }
   0x4   : > { %p189_p2 = pnand %p758_p0, %p188_p1 }
   0x5   : > { %v244_v0 = vld [vmem:[%s1200_s1] sm:$0xff] (!%p189_p2)  ;;  %v245_v1 = vld [vmem:[%s1200_s1 + $0x8] sm:$0xff] (!%p189_p2)  ;;  %v246_v2 = vld [vmem:[%s1200_s1 + $0x10] sm:$0xff] (!%p189_p2)  ;;  %s759_s26 = sshll.u32 (!%p189_p2), %s754_s19, 4  ;;  %vm261_vm0 = vcmask (!%p189_p2), 654336   ;;  %vm681_vm1 = vcmask (!%p189_p2), 326656  }
   0x6   : > { %192 = sbr.rel (%p189_p2) target bundleno = 490 (0x1ea), region = 40  ;;  %v939_v3 = vpack.c.bf16 (!%p189_p2), %v245_v1, %v244_v0  ;;  %v247_v4 = vld [vmem:[%s1200_s1 + $0x18] sm:$0xff] (!%p189_p2)  ;;  %p217_p3 = scmp.lt.s32.totalorder (!%p189_p2), %s759_s26, 31  ;;  %v248_v6 = vld [vmem:[%s1200_s1 + $0x20] sm:$0xff] (!%p189_p2)  ;;  %v249_v7 = vld [vmem:[%s1200_s1 + $0x28] sm:$0xff] (!%p189_p2) }
   0x7   : > { %v943_v5 = vpack.c.bf16 (!%p189_p2), %v247_v4, %v246_v2  ;;  %v471_v8 = vld [vmem:[%s1202_s3] sm:$0xff] (!%p189_p2)  ;;  %v472_v9 = vld [vmem:[%s1202_s3 + $0x8] sm:$0xff] (!%p189_p2)  ;;  %v473_v11 = vld [vmem:[%s1202_s3 + $0x10] sm:$0xff] (!%p189_p2)  ;;  %v947_v13 = vpack.c.bf16 (!%p189_p2), %v249_v7, %v248_v6 }
   0x8   : > { %940 = vmatprep.subr.bf16.mxu0 (!%p189_p2), %v939_v3  ;;  %v959_v10 = vpack.c.bf16 (!%p189_p2), %v472_v9, %v471_v8  ;;  %v474_v12 = vld [vmem:[%s1202_s3 + $0x18] sm:$0xff] (!%p189_p2)  ;;  %v475_v15 = vld [vmem:[%s1202_s3 + $0x20] sm:$0xff] (!%p189_p2)  ;;  %v476_v16 = vld [vmem:[%s1202_s3 + $0x28] sm:$0xff] (!%p189_p2) }
   0x9   : > { %942 = vmatpush3.bf16.msra.mxu0 (!%p189_p2), %v939_v3  ;;  %v963_v14 = vpack.c.bf16 (!%p189_p2), %v474_v12, %v473_v11  ;;  %v250_v17 = vld [vmem:[%s1200_s1 + $0x30] sm:$0xff] (!%p189_p2)  ;;  %v251_v18 = vld [vmem:[%s1200_s1 + $0x38] sm:$0xff] (!%p189_p2)  ;;  %v967_v20 = vpack.c.bf16 (!%p189_p2), %v476_v16, %v475_v15  ;;  %v252_v24 = vld [vmem:[%s1200_s1 + $0x40] sm:$0xff] (!%p189_p2) }
   0xa   : > { %944 = vmatprep.subr.bf16.mxu0 (!%p189_p2), %v943_v5  ;;  %960 = vmatprep.subr.bf16.mxu1 (!%p189_p2), %v959_v10  ;;  %v951_v21 = vpack.c.bf16 (!%p189_p2), %v251_v18, %v250_v17  ;;  %v477_v22 = vld [vmem:[%s1202_s3 + $0x30] sm:$0xff] (!%p189_p2)  ;;  %v478_v23 = vld [vmem:[%s1202_s3 + $0x38] sm:$0xff] (!%p189_p2)  ;;  %v253_v25 = vld [vmem:[%s1200_s1 + $0x48] sm:$0xff] (!%p189_p2) }
   0xb   : > { %962 = vmatpush3.bf16.msra.mxu1 (!%p189_p2), %v959_v10  ;;  %v971_v26 = vpack.c.bf16 (!%p189_p2), %v478_v23, %v477_v22  ;;  %v955_v27 = vpack.c.bf16 (!%p189_p2), %v253_v25, %v252_v24  ;;  %v479_v43 = vld [vmem:[%s1202_s3 + $0x40] sm:$0xff] (!%p189_p2)  ;;  %v480_v44 = vld [vmem:[%s1202_s3 + $0x48] sm:$0xff] (!%p189_p2) }
   0xc   : > { %964 = vmatprep.subr.bf16.mxu1 (!%p189_p2), %v963_v14  ;;  %v975_v45 = vpack.c.bf16 (!%p189_p2), %v480_v44, %v479_v43  ;;  %v763_v46 = vld [vmem:[%s1201_s2] ss:$0 sm:$0xff] (!%p189_p2) }
   0xd   : > { %s1206_s26 = smov (!%p217_p3, %s759_s26), 31  ;;  %946 = vmatpush3.bf16.msra.mxu0 %v943_v5 }
   0xe   : > { %s760_s16 = sshll.u32 %s1206_s26, 3  ;;  %948 = vmatprep.subr.bf16.mxu0 %v947_v13 }
   0xf   : > { %s1083_s29 = scalar_lea.vmem %s1199_s0, %s760_s16  ;;  %966 = vmatpush3.bf16.msra.mxu1 %v963_v14  ;;  %s1162_s25 = scalar_lea.vmem %s1204_s5, %s760_s16 }
  0x10   : > { %v228_v19 = vld [vmem:[%s1083_s29] sm:$0xff]  ;;  %968 = vmatprep.subr.bf16.mxu1 %v967_v20  ;;  %v229_v28 = vld [vmem:[%s1083_s29 + $0x8] sm:$0xff]  ;;  %v230_v29 = vld [vmem:[%s1083_s29 + $0x10] sm:$0xff] }
  0x11   : > { %871 = vmatprep.mubr.msk.f32.mxu0 %vm261_vm0, %v228_v19  ;;  %950 = vmatpush3.bf16.msra.mxu0 %v947_v13  ;;  %v231_v30 = vld [vmem:[%s1083_s29 + $0x18] sm:$0xff]  ;;  %v232_v31 = vld [vmem:[%s1083_s29 + $0x20] sm:$0xff]  ;;  %v233_v32 = vld [vmem:[%s1083_s29 + $0x28] sm:$0xff] }
  0x12   : > { %952 = vmatprep.subr.bf16.mxu0 %v951_v21  ;;  %v234_v33 = vld [vmem:[%s1083_s29 + $0x30] sm:$0xff]  ;;  %v235_v34 = vld [vmem:[%s1083_s29 + $0x38] sm:$0xff]  ;;  %v236_v35 = vld [vmem:[%s1083_s29 + $0x40] sm:$0xff] }
  0x13   : > { %970 = vmatpush3.bf16.msra.mxu1 %v967_v20  ;;  %v237_v36 = vld [vmem:[%s1083_s29 + $0x48] sm:$0xff]  ;;  %v238_v37 = vld [vmem:[%s1083_s29 + $0x50] sm:$0xff]  ;;  %v239_v38 = vld [vmem:[%s1083_s29 + $0x58] sm:$0xff] }
  0x14   : > { %972 = vmatprep.subr.bf16.mxu1 %v971_v26  ;;  %v240_v39 = vld [vmem:[%s1083_s29 + $0x60] sm:$0xff]  ;;  %v241_v40 = vld [vmem:[%s1083_s29 + $0x68] sm:$0xff]  ;;  %v242_v41 = vld [vmem:[%s1083_s29 + $0x70] sm:$0xff] }
  0x15   : > { %954 = vmatpush3.bf16.msra.mxu0 %v951_v21  ;;  %v243_v42 = vld [vmem:[%s1083_s29 + $0x78] sm:$0xff] }
  0x16   : > { %956 = vmatprep.subr.bf16.mxu0 %v955_v27 }
  0x17   : > { %974 = vmatpush3.bf16.msra.mxu1 %v971_v26 }
  0x18   : > { %976 = vmatprep.subr.bf16.mxu1 %v975_v45 }
  0x19   : > { %958 = vmatpush3.bf16.msra.mxu0 %v955_v27 }
  0x1b   : > { %978 = vmatpush3.bf16.msra.mxu1 %v975_v45 }
  0x1c   : > { %872 = vmatmul.mubr.msk.f32.vlgmr.msra.gmra.mrb[0].mxu0 %vm261_vm0, %v229_v28 }
  0x1d   : > { %874 = vmatprep.mubr.msk.f32.mxu0 %vm261_vm0, %v230_v29 }
  0x20   : > { %875 = vmatmul.mubr.msk.f32.gmra.mrb[2].mxu0 %vm261_vm0, %v231_v30 }
  0x21   : > { %877 = vmatprep.mubr.msk.f32.mxu0 %vm261_vm0, %v232_v31  ;;  %v780_v31 = vld [vmem:[%s1203_s4] ss:$0 sm:$0xff] }
  0x24   : > { %878 = vmatmul.mubr.msk.f32.gmra.mrb[4].mxu0 %vm261_vm0, %v233_v32 }
  0x25   : > { %880 = vmatprep.mubr.msk.f32.mxu0 %vm261_vm0, %v234_v33 }
  0x28   : > { %881 = vmatmul.mubr.msk.f32.gmra.mrb[6].mxu0 %vm261_vm0, %v235_v34 }
  0x29   : > { %883 = vmatprep.mubr.msk.f32.mxu0 %vm261_vm0, %v236_v35 }
  0x2c   : > { %884 = vmatmul.mubr.msk.f32.gmra.mrb[8].mxu0 %vm261_vm0, %v237_v36 }
  0x2d   : > { %886 = vmatprep.mubr.msk.f32.mxu0 %vm261_vm0, %v238_v37 }
  0x30   : > { %887 = vmatmul.mubr.msk.f32.gmra.mrb[10].mxu0 %vm261_vm0, %v239_v38 }
  0x31   : > { %889 = vmatprep.mubr.msk.f32.mxu0 %vm261_vm0, %v240_v39 }
  0x34   : > { %890 = vmatmul.mubr.msk.f32.gmra.mrb[12].mxu0 %vm261_vm0, %v241_v40 }
  0x35   : > { %892 = vmatprep.mubr.msk.f32.mxu0 %vm261_vm0, %v242_v41 }
  0x38   : > { %893 = vmatmul.mubr.msk.f32.gmra.mrb[14].mxu0 %vm261_vm0, %v243_v42 }
  0xef   : > { %v873_v47 = vpop.f32.mrb[0].mxu0 }
  0xf0   : > { %v382_v48 = vadd.f32 %v873_v47, %v763_v46  ;;  %v376_v49 = vpop.f32.mrb[1].mxu0 }
  0xf1   : > { %v377_v50 = vadd.f32 %v763_v46, %v376_v49 }
  0xf2   : > { %v456_v53 = vmax.f32 %v382_v48, 0.0 }
  0xf3   : > { %v455_v51 = vmax.f32 %v377_v50, 0.0  ;;  %v876_v52 = vpop.f32.mrb[2].mxu0 }
  0xf4   : > { %v392_v54 = vadd.f32 %v876_v52, %v763_v46  ;;  %v386_v55 = vpop.f32.mrb[3].mxu0 }
  0xf5   : > { %v387_v56 = vadd.f32 %v763_v46, %v386_v55  ;;  %915 = vmatprep.mubr.msk.f32.mxu1 %vm261_vm0, %v455_v51 }
  0xf6   : > { %916 = vmatmul.mubr.msk.f32.vlgmr.msra.gmra.mrb[0].mxu1 %vm261_vm0, %v456_v53  ;;  %v458_v59 = vmax.f32 %v392_v54, 0.0 }
  0xf7   : > { %v457_v57 = vmax.f32 %v387_v56, 0.0  ;;  %v879_v58 = vpop.f32.mrb[4].mxu0 }
  0xf8   : > { %v402_v60 = vadd.f32 %v879_v58, %v763_v46  ;;  %v396_v61 = vpop.f32.mrb[5].mxu0 }
  0xf9   : > { %v397_v62 = vadd.f32 %v763_v46, %v396_v61  ;;  %918 = vmatprep.mubr.msk.f32.mxu1 %vm261_vm0, %v457_v57 }
  0xfa   : > { %919 = vmatmul.mubr.msk.f32.gmra.mrb[2].mxu1 %vm261_vm0, %v458_v59  ;;  %v460_v1 = vmax.f32 %v402_v60, 0.0 }
  0xfb   : > { %v459_v63 = vmax.f32 %v397_v62, 0.0  ;;  %v882_v0 = vpop.f32.mrb[6].mxu0 }
  0xfc   : > { %v412_v2 = vadd.f32 %v882_v0, %v763_v46  ;;  %v406_v3 = vpop.f32.mrb[7].mxu0 }
  0xfd   : > { %v407_v4 = vadd.f32 %v763_v46, %v406_v3  ;;  %921 = vmatprep.mubr.msk.f32.mxu1 %vm261_vm0, %v459_v63 }
  0xfe   : > { %922 = vmatmul.mubr.msk.f32.gmra.mrb[4].mxu1 %vm261_vm0, %v460_v1  ;;  %v462_v7 = vmax.f32 %v412_v2, 0.0 }
  0xff   : > { %v461_v5 = vmax.f32 %v407_v4, 0.0  ;;  %v885_v6 = vpop.f32.mrb[8].mxu0 }
 0x100   : > { %v422_v8 = vadd.f32 %v885_v6, %v763_v46  ;;  %v416_v9 = vpop.f32.mrb[9].mxu0 }
 0x101   : > { %v417_v10 = vadd.f32 %v763_v46, %v416_v9  ;;  %924 = vmatprep.mubr.msk.f32.mxu1 %vm261_vm0, %v461_v5 }
 0x102   : > { %925 = vmatmul.mubr.msk.f32.gmra.mrb[6].mxu1 %vm261_vm0, %v462_v7  ;;  %v464_v13 = vmax.f32 %v422_v8, 0.0 }
 0x103   : > { %v463_v11 = vmax.f32 %v417_v10, 0.0  ;;  %v888_v12 = vpop.f32.mrb[10].mxu0 }
 0x104   : > { %v432_v14 = vadd.f32 %v888_v12, %v763_v46  ;;  %v426_v15 = vpop.f32.mrb[11].mxu0 }
 0x105   : > { %v427_v16 = vadd.f32 %v763_v46, %v426_v15  ;;  %927 = vmatprep.mubr.msk.f32.mxu1 %vm261_vm0, %v463_v11 }
 0x106   : > { %928 = vmatmul.mubr.msk.f32.gmra.mrb[8].mxu1 %vm261_vm0, %v464_v13  ;;  %v466_v19 = vmax.f32 %v432_v14, 0.0 }
 0x107   : > { %v465_v17 = vmax.f32 %v427_v16, 0.0  ;;  %v891_v18 = vpop.f32.mrb[12].mxu0 }
 0x108   : > { %v442_v20 = vadd.f32 %v891_v18, %v763_v46  ;;  %v436_v21 = vpop.f32.mrb[13].mxu0 }
 0x109   : > { %v437_v22 = vadd.f32 %v763_v46, %v436_v21  ;;  %930 = vmatprep.mubr.msk.f32.mxu1 %vm261_vm0, %v465_v17 }
 0x10a   : > { %931 = vmatmul.mubr.msk.f32.gmra.mrb[10].mxu1 %vm261_vm0, %v466_v19  ;;  %v468_v25 = vmax.f32 %v442_v20, 0.0 }
 0x10b   : > { %v467_v23 = vmax.f32 %v437_v22, 0.0  ;;  %v894_v24 = vpop.f32.mrb[14].mxu0 }
 0x10c   : > { %v452_v26 = vadd.f32 %v894_v24, %v763_v46  ;;  %v446_v27 = vpop.f32.mrb[15].mxu0 }
 0x10d   : > { %v447_v28 = vadd.f32 %v763_v46, %v446_v27  ;;  %933 = vmatprep.mubr.msk.f32.mxu1 %vm261_vm0, %v467_v23 }
 0x10e   : > { %934 = vmatmul.mubr.msk.f32.gmra.mrb[12].mxu1 %vm261_vm0, %v468_v25  ;;  %v470_v30 = vmax.f32 %v452_v26, 0.0 }
 0x10f   : > { %v469_v29 = vmax.f32 %v447_v28, 0.0 }
 0x111   : > { %936 = vmatprep.mubr.msk.f32.mxu1 %vm261_vm0, %v469_v29 }
 0x112   : > { %937 = vmatmul.mubr.msk.f32.gmra.mrb[14].mxu1 %vm261_vm0, %v470_v30 }
 0x1c9   : > { %v917_v32 = vpop.f32.mrb[0].mxu1 }
 0x1ca   : > { %v608_v33 = vadd.f32 %v917_v32, %v780_v31  ;;  %v602_v34 = vpop.f32.mrb[1].mxu1 }
 0x1cb   : > { %v603_v35 = vadd.f32 %v780_v31, %v602_v34 }
 0x1cc   : > { %683 = vst.msk [vmem:[%s1162_s25 + $0x8] sm:$0xff] %vm681_vm1, %v608_v33 }
 0x1cd   : > { %682 = vst.msk [vmem:[%s1162_s25] sm:$0xff] %vm681_vm1, %v603_v35  ;;  %v920_v36 = vpop.f32.mrb[2].mxu1 }
 0x1ce   : > { %v618_v37 = vadd.f32 %v920_v36, %v780_v31  ;;  %v612_v38 = vpop.f32.mrb[3].mxu1 }
 0x1cf   : > { %v613_v39 = vadd.f32 %v780_v31, %v612_v38 }
 0x1d0   : > { %685 = vst.msk [vmem:[%s1162_s25 + $0x18] sm:$0xff] %vm681_vm1, %v618_v37 }
 0x1d1   : > { %684 = vst.msk [vmem:[%s1162_s25 + $0x10] sm:$0xff] %vm681_vm1, %v613_v39  ;;  %v923_v40 = vpop.f32.mrb[4].mxu1 }
 0x1d2   : > { %v628_v41 = vadd.f32 %v923_v40, %v780_v31  ;;  %v622_v42 = vpop.f32.mrb[5].mxu1 }
 0x1d3   : > { %v623_v43 = vadd.f32 %v780_v31, %v622_v42 }
 0x1d4   : > { %687 = vst.msk [vmem:[%s1162_s25 + $0x28] sm:$0xff] %vm681_vm1, %v628_v41 }
 0x1d5   : > { %686 = vst.msk [vmem:[%s1162_s25 + $0x20] sm:$0xff] %vm681_vm1, %v623_v43  ;;  %v926_v44 = vpop.f32.mrb[6].mxu1 }
 0x1d6   : > { %v638_v45 = vadd.f32 %v926_v44, %v780_v31  ;;  %v632_v46 = vpop.f32.mrb[7].mxu1 }
 0x1d7   : > { %v633_v47 = vadd.f32 %v780_v31, %v632_v46 }
 0x1d8   : > { %689 = vst.msk [vmem:[%s1162_s25 + $0x38] sm:$0xff] %vm681_vm1, %v638_v45 }
 0x1d9   : > { %688 = vst.msk [vmem:[%s1162_s25 + $0x30] sm:$0xff] %vm681_vm1, %v633_v47  ;;  %v929_v48 = vpop.f32.mrb[8].mxu1 }
 0x1da   : > { %v648_v49 = vadd.f32 %v929_v48, %v780_v31  ;;  %v642_v50 = vpop.f32.mrb[9].mxu1 }
 0x1db   : > { %v643_v51 = vadd.f32 %v780_v31, %v642_v50 }
 0x1dc   : > { %691 = vst.msk [vmem:[%s1162_s25 + $0x48] sm:$0xff] %vm681_vm1, %v648_v49 }
 0x1dd   : > { %690 = vst.msk [vmem:[%s1162_s25 + $0x40] sm:$0xff] %vm681_vm1, %v643_v51  ;;  %v932_v52 = vpop.f32.mrb[10].mxu1 }
 0x1de   : > { %v658_v53 = vadd.f32 %v932_v52, %v780_v31  ;;  %v652_v54 = vpop.f32.mrb[11].mxu1 }
 0x1df   : > { %v653_v55 = vadd.f32 %v780_v31, %v652_v54 }
 0x1e0   : > { %693 = vst.msk [vmem:[%s1162_s25 + $0x58] sm:$0xff] %vm681_vm1, %v658_v53 }
 0x1e1   : > { %692 = vst.msk [vmem:[%s1162_s25 + $0x50] sm:$0xff] %vm681_vm1, %v653_v55  ;;  %v935_v56 = vpop.f32.mrb[12].mxu1 }
 0x1e2   : > { %v668_v57 = vadd.f32 %v935_v56, %v780_v31  ;;  %v662_v58 = vpop.f32.mrb[13].mxu1 }
 0x1e3   : > { %v663_v59 = vadd.f32 %v780_v31, %v662_v58 }
 0x1e4   : > { %695 = vst.msk [vmem:[%s1162_s25 + $0x68] sm:$0xff] %vm681_vm1, %v668_v57 }
 0x1e5   : > { %694 = vst.msk [vmem:[%s1162_s25 + $0x60] sm:$0xff] %vm681_vm1, %v663_v59  ;;  %v938_v60 = vpop.f32.mrb[14].mxu1 }
 0x1e6   : > { %v678_v61 = vadd.f32 %v938_v60, %v780_v31  ;;  %v672_v62 = vpop.f32.mrb[15].mxu1 }
 0x1e7   : > { %v673_v63 = vadd.f32 %v780_v31, %v672_v62 }
 0x1e8   : > { %697 = vst.msk [vmem:[%s1162_s25 + $0x78] sm:$0xff] %vm681_vm1, %v678_v61 }
 0x1e9   : > { %696 = vst.msk [vmem:[%s1162_s25 + $0x70] sm:$0xff] %vm681_vm1, %v673_v63 }
 0x1ea PF: > { %s15_s18 = sadd.s32 1, %s993_s18  }
 0x1eb   : > { %p12_p4 = scmp.ge.s32.totalorder %s15_s18, 4  }
 0x1ed   :  { %14 = sbr.rel (!%p12_p4) target bundleno = 1 (0x1), region = 70 }

</bundles_post_ra>
